<compile_context>
chip_gen: v7x
topology: tpu7x:2x2x1
jax: 0.10.0
libtpu: 0.0.40
codegen_flags: <defaults>
</compile_context>

<pallas_src>
import functools

import numpy as np
import jax
import jax.numpy as jnp
from jax.experimental import pallas as pl
from jax.experimental.pallas import tpu as pltpu

_VMEM_LIMIT_BYTES = 32 * 1024 * 1024   # safe on v5e/v6e (128 MiB) and v7x (64 MiB)


# ---------------------------------------------------------------------------
# In-kernel helpers
# ---------------------------------------------------------------------------
def _rmsnorm(x, w, eps):
    # x: (S, H) f32, w: (1, H) f32
    var = jnp.mean(x * x, axis=-1, keepdims=True)
    return w * (x * jax.lax.rsqrt(var + eps))


# ---------------------------------------------------------------------------
# Kernel 1: RMSNorm + fused QKV(+rotate_half) projection + full-width RoPE
# grid = (B, num_seq_tiles)
# ---------------------------------------------------------------------------
def qkv_rope_kernel(x_ref, cos_ref, sin_ref, ln1_ref, wqkvr_ref,
                    q_ref, k_ref, v_ref, *, hidden, eps):
    x = x_ref[0].astype(jnp.float32)                       # (Sq, H)
    h = _rmsnorm(x, ln1_ref[...], eps)
    # single fused MXU matmul: [q | k | v | rot(q) | rot(k)]
    qkvr = jnp.dot(h.astype(jnp.bfloat16), wqkvr_ref[...],
                   preferred_element_type=jnp.float32)     # (Sq, 5H) f32
    H = hidden
    q, k, v = qkvr[:, 0:H], qkvr[:, H:2 * H], qkvr[:, 2 * H:3 * H]
    q_rot, k_rot = qkvr[:, 3 * H:4 * H], qkvr[:, 4 * H:5 * H]
    cos = cos_ref[...]                                     # (Sq, H) per-head tiled
    sin = sin_ref[...]
    q_ref[0] = (q * cos + q_rot * sin).astype(q_ref.dtype)
    k_ref[0] = (k * cos + k_rot * sin).astype(k_ref.dtype)
    v_ref[0] = v.astype(v_ref.dtype)


# ---------------------------------------------------------------------------
# Kernel 2: attention + o_proj + residual + RMSNorm + SwiGLU MLP + residual
# grid = (B, num_seq_tiles); K/V are full-seq resident, queries are tiled.
# ---------------------------------------------------------------------------
def attn_mlp_kernel(xres_ref, q_ref, k_ref, v_ref,
                    wo_ref, ln2_ref, wgu_ref, wd_ref,
                    out_ref, attn_scr, *, num_heads, head_dim, inter, eps):
    q = q_ref[0]                       # (Sq, H) bf16, RoPE applied
    k = k_ref[0]                       # (S , H) bf16
    v = v_ref[0]                       # (S , H) bf16
    scaling = head_dim ** (-0.5)
    d = head_dim
    for hd in range(num_heads):        # small, unrolled at trace time
        sl = slice(hd * d, (hd + 1) * d)
        scores = jax.lax.dot_general(
            q[:, sl], k[:, sl], (((1,), (1,)), ((), ())),
            preferred_element_type=jnp.float32) * scaling          # (Sq, S)
        m = jnp.max(scores, axis=-1, keepdims=True)
        p = jnp.exp(scores - m)
        denom = jnp.sum(p, axis=-1, keepdims=True)
        p = p * pl.reciprocal(denom, approx=True)                  # EUP slot
        attn_scr[:, sl] = jnp.dot(p.astype(jnp.bfloat16), v[:, sl],
                                  preferred_element_type=jnp.float32)
    # single o_proj with K = H
    o = jnp.dot(attn_scr[...].astype(jnp.bfloat16), wo_ref[...],
                preferred_element_type=jnp.float32)                # (Sq, H)
    h1 = xres_ref[0].astype(jnp.float32) + o
    h2 = _rmsnorm(h1, ln2_ref[...], eps)
    gu = jnp.dot(h2.astype(jnp.bfloat16), wgu_ref[...],
                 preferred_element_type=jnp.float32)               # (Sq, 2I)
    g, u = gu[:, :inter], gu[:, inter:]
    act = g * jax.nn.sigmoid(g) * u                                # SiLU * up
    mlp = jnp.dot(act.astype(jnp.bfloat16), wd_ref[...],
                  preferred_element_type=jnp.float32)
    out_ref[0] = (h1 + mlp).astype(out_ref.dtype)


def final_norm_kernel(x_ref, w_ref, out_ref, *, eps):
    out_ref[0] = _rmsnorm(x_ref[0].astype(jnp.float32), w_ref[...],
                          eps).astype(out_ref.dtype)


# ---------------------------------------------------------------------------
# Wrappers
# ---------------------------------------------------------------------------
def _seq_tile(S):
    if S <= 256:
        return S
    for t in (256, 128, 64, 32, 16, 8):
        if S % t == 0:
            return t
    return S


def run_qkv_rope(x, cos_f, sin_f, ln1, wqkvr, *, sq, eps):
    B, S, H = x.shape
    kern = functools.partial(qkv_rope_kernel, hidden=H, eps=eps)
    bshape = jax.ShapeDtypeStruct((B, S, H), jnp.bfloat16)
    return pl.pallas_call(
        kern,
        out_shape=(bshape, bshape, bshape),
        grid_spec=pltpu.PrefetchScalarGridSpec(
            num_scalar_prefetch=0,
            grid=(B, S // sq),
            in_specs=[
                pl.BlockSpec((1, sq, H), lambda b, s: (b, s, 0)),   # x (bf16)
                pl.BlockSpec((sq, H), lambda b, s: (s, 0)),         # cos tiled
                pl.BlockSpec((sq, H), lambda b, s: (s, 0)),         # sin tiled
                pl.BlockSpec((1, H), lambda b, s: (0, 0)),          # ln1
                pl.BlockSpec((H, 5 * H), lambda b, s: (0, 0)),      # fused qkv+rot
            ],
            out_specs=[pl.BlockSpec((1, sq, H), lambda b, s: (b, s, 0))] * 3,
        ),
        compiler_params=pltpu.CompilerParams(
            dimension_semantics=("parallel", "parallel"),
            vmem_limit_bytes=_VMEM_LIMIT_BYTES),
    )(x, cos_f, sin_f, ln1, wqkvr)


def run_attn_mlp(x, q, k, v, layer, *, sq, num_heads, head_dim, eps):
    B, S, H = x.shape
    I = layer["wd_t"].shape[0]
    kern = functools.partial(attn_mlp_kernel, num_heads=num_heads,
                             head_dim=head_dim, inter=I, eps=eps)
    return pl.pallas_call(
        kern,
        out_shape=jax.ShapeDtypeStruct((B, S, H), jnp.bfloat16),
        grid_spec=pltpu.PrefetchScalarGridSpec(
            num_scalar_prefetch=0,
            grid=(B, S // sq),
            in_specs=[
                pl.BlockSpec((1, sq, H), lambda b, s: (b, s, 0)),   # residual x
                pl.BlockSpec((1, sq, H), lambda b, s: (b, s, 0)),   # q tile
                pl.BlockSpec((1, S, H), lambda b, s: (b, 0, 0)),    # k full seq
                pl.BlockSpec((1, S, H), lambda b, s: (b, 0, 0)),    # v full seq
                pl.BlockSpec((H, H), lambda b, s: (0, 0)),          # wo (pre-T)
                pl.BlockSpec((1, H), lambda b, s: (0, 0)),          # ln2
                pl.BlockSpec((H, 2 * I), lambda b, s: (0, 0)),      # fused gate/up
                pl.BlockSpec((I, H), lambda b, s: (0, 0)),          # wd (pre-T)
            ],
            out_specs=pl.BlockSpec((1, sq, H), lambda b, s: (b, s, 0)),
            scratch_shapes=[pltpu.VMEM((sq, H), jnp.float32)],      # attn slab
        ),
        input_output_aliases={0: 0},   # write new residual over old residual
        compiler_params=pltpu.CompilerParams(
            dimension_semantics=("parallel", "parallel"),
            vmem_limit_bytes=_VMEM_LIMIT_BYTES),
    )(x, q, k, v, layer["wo_t"], layer["ln2"], layer["wgu"], layer["wd_t"])


def run_final_norm(x, w, *, eps):
    B, S, H = x.shape
    return pl.pallas_call(
        functools.partial(final_norm_kernel, eps=eps),
        out_shape=jax.ShapeDtypeStruct((B, S, H), jnp.float32),
        grid_spec=pltpu.PrefetchScalarGridSpec(
            num_scalar_prefetch=0,
            grid=(B,),
            in_specs=[pl.BlockSpec((1, S, H), lambda b: (b, 0, 0)),
                      pl.BlockSpec((1, H), lambda b: (0, 0))],
            out_specs=pl.BlockSpec((1, S, H), lambda b: (b, 0, 0)),
        ),
        compiler_params=pltpu.CompilerParams(
            dimension_semantics=("parallel",),
            vmem_limit_bytes=_VMEM_LIMIT_BYTES),
    )(x, w)


# ---------------------------------------------------------------------------
# Host-side parameter preprocessing (transpose / fuse / bf16 cast, once)
# ---------------------------------------------------------------------------
def _rotate_half_matrix(hidden, num_heads, head_dim):
    half = head_dim // 2
    R = np.zeros((hidden, hidden), np.float32)
    for h in range(num_heads):
        base = h * head_dim
        for i in range(half):
            R[base + half + i, base + i] = -1.0   # first half <- -(second half)
            R[base + i, base + half + i] = 1.0    # second half <- +(first half)
    return jnp.asarray(R)


def preprocess_params(params, *, num_heads, head_dim):
    H = params["embed"].shape[1]
    R = _rotate_half_matrix(H, num_heads, head_dim)
    prepped = {
        "embed": params["embed"],
        "norm": params["norm"].reshape(1, H).astype(jnp.float32),
        "cos_cached": params["cos_cached"],
        "sin_cached": params["sin_cached"],
        "layers": [],
    }
    for layer in params["layers"]:
        wq_t, wk_t, wv_t = layer["wq"].T, layer["wk"].T, layer["wv"].T
        wqkvr = jnp.concatenate(
            [wq_t, wk_t, wv_t, wq_t @ R, wk_t @ R], axis=1).astype(jnp.bfloat16)
        wgu = jnp.concatenate([layer["wg"].T, layer["wu"].T],
                              axis=1).astype(jnp.bfloat16)
        prepped["layers"].append({
            "ln1": layer["ln1"].reshape(1, H).astype(jnp.float32),
            "ln2": layer["ln2"].reshape(1, H).astype(jnp.float32),
            "wqkvr": wqkvr,
            "wo_t": layer["wo"].T.astype(jnp.bfloat16),
            "wgu": wgu,
            "wd_t": layer["wd"].T.astype(jnp.bfloat16),
        })
    return prepped


def smollm2_forward(input_ids, prepped, *, num_heads, head_dim, eps):
    B, S = input_ids.shape
    # Embedding gather stays in plain JAX (glue); residual stream is bf16.
    x = jnp.take(prepped["embed"], input_ids, axis=0).astype(jnp.bfloat16)
    cos_f = jnp.tile(prepped["cos_cached"][:S], (1, num_heads))   # (S, H) f32
    sin_f = jnp.tile(prepped["sin_cached"][:S], (1, num_heads))
    sq = _seq_tile(S)
    for layer in prepped["layers"]:
        q, k, v = run_qkv_rope(x, cos_f, sin_f, layer["ln1"], layer["wqkvr"],
                               sq=sq, eps=eps)
        x = run_attn_mlp(x, q, k, v, layer, sq=sq, num_heads=num_heads,
                         head_dim=head_dim, eps=eps)
    return run_final_norm(x, prepped["norm"], eps=eps)


# ---------------------------------------------------------------------------
# Pure-JAX f32 reference (mirrors the PyTorch forward math)
# ---------------------------------------------------------------------------
def _rotate_half(x):
    half = x.shape[-1] // 2
    return jnp.concatenate([-x[..., half:], x[..., :half]], axis=-1)


def ref_forward(input_ids, params, *, num_heads, head_dim, eps):
    B, S = input_ids.shape
    x = jnp.take(params["embed"], input_ids, axis=0)
    cos = params["cos_cached"][:S][None, :, :]
    sin = params["sin_cached"][:S][None, :, :]
    scaling = head_dim ** (-0.5)
    for layer in params["layers"]:
        h = layer["ln1"] * (x * jax.lax.rsqrt(
            jnp.mean(x * x, axis=-1, keepdims=True) + eps))
        q = h @ layer["wq"].T
        k = h @ layer["wk"].T
        v = h @ layer["wv"].T
        H = q.shape[-1]
        q = q.reshape(B, S, num_heads, head_dim).transpose(0, 2, 1, 3)
        k = k.reshape(B, S, num_heads, head_dim).transpose(0, 2, 1, 3)
        v = v.reshape(B, S, num_heads, head_dim).transpose(0, 2, 1, 3)
        c = cos[:, None, :, :]
        s = sin[:, None, :, :]
        q = q * c + _rotate_half(q) * s
        k = k * c + _rotate_half(k) * s
        scores = jnp.einsum("bhqd,bhkd->bhqk", q, k) * scaling
        p = jax.nn.softmax(scores.astype(jnp.float32), axis=-1)
        attn = jnp.einsum("bhqk,bhkd->bhqd", p, v)
        attn = attn.transpose(0, 2, 1, 3).reshape(B, S, H)
        x = x + attn @ layer["wo"].T
        h = layer["ln2"] * (x * jax.lax.rsqrt(
            jnp.mean(x * x, axis=-1, keepdims=True) + eps))
        g = h @ layer["wg"].T
        u = h @ layer["wu"].T
        x = x + (g * jax.nn.sigmoid(g) * u) @ layer["wd"].T
    x = params["norm"] * (x * jax.lax.rsqrt(
        jnp.mean(x * x, axis=-1, keepdims=True) + eps))
    return x


# ---------------------------------------------------------------------------
# Deterministic parameter construction + driver
# ---------------------------------------------------------------------------
def make_params(key, *, vocab, hidden, inter, n_layers, head_dim, max_pos):
    keys = jax.random.split(key, 1 + 7 * n_layers)
    init = lambda k, shape: 0.02 * jax.random.normal(k, shape, jnp.float32)
    params = {
        "embed": init(keys[0], (vocab, hidden)),
        "norm": jnp.ones((hidden,), jnp.float32),
        "layers": [],
    }
    ki = 1
    for _ in range(n_layers):
        layer = {
            "wq": init(keys[ki + 0], (hidden, hidden)),
            "wk": init(keys[ki + 1], (hidden, hidden)),
            "wv": init(keys[ki + 2], (hidden, hidden)),
            "wo": init(keys[ki + 3], (hidden, hidden)),
            "wg": init(keys[ki + 4], (inter, hidden)),
            "wu": init(keys[ki + 5], (inter, hidden)),
            "wd": init(keys[ki + 6], (hidden, inter)),
            "ln1": jnp.ones((hidden,), jnp.float32),
            "ln2": jnp.ones((hidden,), jnp.float32),
        }
        params["layers"].append(layer)
        ki += 7
    # Rotary tables (same construction as LlamaRotaryEmbedding)
    inv_freq = 1.0 / (10000.0 ** (jnp.arange(0, head_dim, 2, dtype=jnp.float32)
                                  / head_dim))
    t = jnp.arange(max_pos, dtype=jnp.float32)
    freqs = jnp.einsum("i,j->ij", t, inv_freq)
    emb = jnp.concatenate([freqs, freqs], axis=-1)
    params["cos_cached"] = jnp.cos(emb)
    params["sin_cached"] = jnp.sin(emb)
    return params


if __name__ == "__main__":
    VOCAB, HIDDEN, INTER = 128, 32, 64
    N_LAYERS, N_HEADS = 2, 2
    HEAD_DIM = HIDDEN // N_HEADS
    MAX_POS = 64
    EPS = 1e-5
    B, S = 2, 8

    key = jax.random.PRNGKey(0)
    pkey, ikey = jax.random.split(key)
    params = make_params(pkey, vocab=VOCAB, hidden=HIDDEN, inter=INTER,
                         n_layers=N_LAYERS, head_dim=HEAD_DIM, max_pos=MAX_POS)
    input_ids = jax.random.randint(ikey, (B, S), 0, VOCAB, dtype=jnp.int32)

    prepped = preprocess_params(params, num_heads=N_HEADS, head_dim=HEAD_DIM)
    out = smollm2_forward(input_ids, prepped, num_heads=N_HEADS,
                          head_dim=HEAD_DIM, eps=EPS)
    out = jax.block_until_ready(out)

    ref = jax.block_until_ready(
        ref_forward(input_ids, params, num_heads=N_HEADS,
                    head_dim=HEAD_DIM, eps=EPS))

    assert out.shape == (B, S, HIDDEN)
    # bf16 MXU operands + bf16 residual/intermediates -> compare with a
    # tolerance that comfortably covers bf16 rounding vs the f32 reference.
    max_err = float(jnp.max(jnp.abs(out - ref)))
    assert jnp.allclose(out, ref, atol=5e-2, rtol=5e-2), max_err
    print("KERNEL_OK")
</pallas_src>

<mosaic_0001>
module attributes {stable_mosaic.version = 11 : i64} {
  func.func @qkv_rope_kernel(%arg0: i32, %arg1: i32, %arg2: memref<1x8x32xbf16, #tpu.memory_space<vmem>>, %arg3: memref<8x32xf32, #tpu.memory_space<vmem>>, %arg4: memref<8x32xf32, #tpu.memory_space<vmem>>, %arg5: memref<1x32xf32, #tpu.memory_space<vmem>>, %arg6: memref<32x160xbf16, #tpu.memory_space<vmem>>, %arg7: memref<1x8x32xbf16, #tpu.memory_space<vmem>>, %arg8: memref<1x8x32xbf16, #tpu.memory_space<vmem>>, %arg9: memref<1x8x32xbf16, #tpu.memory_space<vmem>>) attributes {dimension_semantics = [#tpu.dimension_semantics<parallel>, #tpu.dimension_semantics<parallel>], iteration_bounds = array<i64: 2, 1>, scalar_prefetch = 0 : i64, scratch_operands = 0 : i64, tpu.core_type = #tpu.core_type<tc>, window_params = [{transform_indices = @transform_0, window_bounds = array<i64: 1, 8, 32>}, {transform_indices = @transform_1, window_bounds = array<i64: 8, 32>}, {transform_indices = @transform_2, window_bounds = array<i64: 8, 32>}, {pipeline_mode = #tpu.pipeline_mode<synchronous>, transform_indices = @transform_3, window_bounds = array<i64: 1, 32>}, {pipeline_mode = #tpu.pipeline_mode<synchronous>, transform_indices = @transform_4, window_bounds = array<i64: 32, 160>}, {transform_indices = @transform_5, window_bounds = array<i64: 1, 8, 32>}, {transform_indices = @transform_6, window_bounds = array<i64: 1, 8, 32>}, {transform_indices = @transform_7, window_bounds = array<i64: 1, 8, 32>}]} {
    %c0 = arith.constant 0 : index
    %c0_0 = arith.constant 0 : index
    %c0_1 = arith.constant 0 : index
    %0 = vector.load %arg2[%c0, %c0_0, %c0_1] : memref<1x8x32xbf16, #tpu.memory_space<vmem>>, vector<1x8x32xbf16>
    %1 = vector.shape_cast %0 : vector<1x8x32xbf16> to vector<8x32xbf16>
    %2 = arith.extf %1 : vector<8x32xbf16> to vector<8x32xf32>
    %c0_2 = arith.constant 0 : index
    %c0_3 = arith.constant 0 : index
    %3 = vector.load %arg5[%c0_2, %c0_3] : memref<1x32xf32, #tpu.memory_space<vmem>>, vector<1x32xf32>
    %4 = arith.mulf %2, %2 : vector<8x32xf32>
    %cst = arith.constant dense<0.000000e+00> : vector<8xf32>
    %5 = vector.multi_reduction <add>, %4, %cst [1] : vector<8x32xf32> to vector<8xf32>
    %6 = vector.shape_cast %5 : vector<8xf32> to vector<8x1xf32>
    %cst_4 = arith.constant 3.200000e+01 : f32
    %7 = vector.broadcast %cst_4 : f32 to vector<8x1xf32>
    %8 = arith.divf %6, %7 : vector<8x1xf32>
    %cst_5 = arith.constant 9.99999974E-6 : f32
    %9 = vector.broadcast %cst_5 : f32 to vector<8x1xf32>
    %10 = arith.addf %8, %9 : vector<8x1xf32>
    %11 = math.rsqrt %10 : vector<8x1xf32>
    %12 = vector.broadcast %11 : vector<8x1xf32> to vector<8x32xf32>
    %13 = arith.mulf %2, %12 : vector<8x32xf32>
    %14 = vector.broadcast %3 : vector<1x32xf32> to vector<8x32xf32>
    %15 = arith.mulf %14, %13 : vector<8x32xf32>
    %16 = arith.truncf %15 : vector<8x32xf32> to vector<8x32xbf16>
    %c0_6 = arith.constant 0 : index
    %c0_7 = arith.constant 0 : index
    %17 = vector.load %arg6[%c0_6, %c0_7] : memref<32x160xbf16, #tpu.memory_space<vmem>>, vector<32x160xbf16>
    %cst_8 = arith.constant dense<0.000000e+00> : vector<8x160xf32>
    %18 = tpu.matmul %16, %17, %cst_8 {dimension_numbers = #tpu.dot_dimension_numbers<[1], [0], [0], [1], [0, 0, 1, 1], [], []>} : vector<8x32xbf16>, vector<32x160xbf16>, vector<8x160xf32> -> vector<8x160xf32>
    %19 = vector.extract_strided_slice %18 {offsets = [0, 0], sizes = [8, 32], strides = [1, 1]} : vector<8x160xf32> to vector<8x32xf32>
    %20 = vector.extract_strided_slice %18 {offsets = [0, 32], sizes = [8, 32], strides = [1, 1]} : vector<8x160xf32> to vector<8x32xf32>
    %21 = vector.extract_strided_slice %18 {offsets = [0, 64], sizes = [8, 32], strides = [1, 1]} : vector<8x160xf32> to vector<8x32xf32>
    %22 = vector.extract_strided_slice %18 {offsets = [0, 96], sizes = [8, 32], strides = [1, 1]} : vector<8x160xf32> to vector<8x32xf32>
    %23 = vector.extract_strided_slice %18 {offsets = [0, 128], sizes = [8, 32], strides = [1, 1]} : vector<8x160xf32> to vector<8x32xf32>
    %c0_9 = arith.constant 0 : index
    %c0_10 = arith.constant 0 : index
    %24 = vector.load %arg3[%c0_9, %c0_10] : memref<8x32xf32, #tpu.memory_space<vmem>>, vector<8x32xf32>
    %c0_11 = arith.constant 0 : index
    %c0_12 = arith.constant 0 : index
    %25 = vector.load %arg4[%c0_11, %c0_12] : memref<8x32xf32, #tpu.memory_space<vmem>>, vector<8x32xf32>
    %26 = arith.mulf %19, %24 : vector<8x32xf32>
    %27 = arith.mulf %22, %25 : vector<8x32xf32>
    %28 = arith.addf %26, %27 : vector<8x32xf32>
    %29 = arith.truncf %28 : vector<8x32xf32> to vector<8x32xbf16>
    %c0_13 = arith.constant 0 : index
    %c0_14 = arith.constant 0 : index
    %c0_15 = arith.constant 0 : index
    %30 = vector.load %arg7[%c0_13, %c0_14, %c0_15] : memref<1x8x32xbf16, #tpu.memory_space<vmem>>, vector<1x8x32xbf16>
    %31 = vector.shape_cast %30 : vector<1x8x32xbf16> to vector<8x32xbf16>
    %32 = vector.shape_cast %29 : vector<8x32xbf16> to vector<1x8x32xbf16>
    tpu.vector_store %arg7[%c0_13, %c0_14, %c0_15], %32 {strides = array<i32>} : memref<1x8x32xbf16, #tpu.memory_space<vmem>>, vector<1x8x32xbf16>,
    %33 = arith.mulf %20, %24 : vector<8x32xf32>
    %34 = arith.mulf %23, %25 : vector<8x32xf32>
    %35 = arith.addf %33, %34 : vector<8x32xf32>
    %36 = arith.truncf %35 : vector<8x32xf32> to vector<8x32xbf16>
    %c0_16 = arith.constant 0 : index
    %c0_17 = arith.constant 0 : index
    %c0_18 = arith.constant 0 : index
    %37 = vector.load %arg8[%c0_16, %c0_17, %c0_18] : memref<1x8x32xbf16, #tpu.memory_space<vmem>>, vector<1x8x32xbf16>
    %38 = vector.shape_cast %37 : vector<1x8x32xbf16> to vector<8x32xbf16>
    %39 = vector.shape_cast %36 : vector<8x32xbf16> to vector<1x8x32xbf16>
    tpu.vector_store %arg8[%c0_16, %c0_17, %c0_18], %39 {strides = array<i32>} : memref<1x8x32xbf16, #tpu.memory_space<vmem>>, vector<1x8x32xbf16>,
    %40 = arith.truncf %21 : vector<8x32xf32> to vector<8x32xbf16>
    %c0_19 = arith.constant 0 : index
    %c0_20 = arith.constant 0 : index
    %c0_21 = arith.constant 0 : index
    %41 = vector.load %arg9[%c0_19, %c0_20, %c0_21] : memref<1x8x32xbf16, #tpu.memory_space<vmem>>, vector<1x8x32xbf16>
    %42 = vector.shape_cast %41 : vector<1x8x32xbf16> to vector<8x32xbf16>
    %43 = vector.shape_cast %40 : vector<8x32xbf16> to vector<1x8x32xbf16>
    tpu.vector_store %arg9[%c0_19, %c0_20, %c0_21], %43 {strides = array<i32>} : memref<1x8x32xbf16, #tpu.memory_space<vmem>>, vector<1x8x32xbf16>,
    return
  }
  func.func @transform_0(%arg0: i32, %arg1: i32) -> (i32, i32, i32) {
    %c0_i32 = arith.constant 0 : i32
    %c0_i32_0 = arith.constant 0 : i32
    return %arg0, %arg1, %c0_i32 : i32, i32, i32
  }
  func.func @transform_1(%arg0: i32, %arg1: i32) -> (i32, i32) {
    %c0_i32 = arith.constant 0 : i32
    %c0_i32_0 = arith.constant 0 : i32
    return %arg1, %c0_i32 : i32, i32
  }
  func.func @transform_2(%arg0: i32, %arg1: i32) -> (i32, i32) {
    %c0_i32 = arith.constant 0 : i32
    %c0_i32_0 = arith.constant 0 : i32
    return %arg1, %c0_i32 : i32, i32
  }
  func.func @transform_3(%arg0: i32, %arg1: i32) -> (i32, i32) {
    %c0_i32 = arith.constant 0 : i32
    %c0_i32_0 = arith.constant 0 : i32
    %c0_i32_1 = arith.constant 0 : i32
    return %c0_i32, %c0_i32_0 : i32, i32
  }
  func.func @transform_4(%arg0: i32, %arg1: i32) -> (i32, i32) {
    %c0_i32 = arith.constant 0 : i32
    %c0_i32_0 = arith.constant 0 : i32
    %c0_i32_1 = arith.constant 0 : i32
    return %c0_i32, %c0_i32_0 : i32, i32
  }
  func.func @transform_5(%arg0: i32, %arg1: i32) -> (i32, i32, i32) {
    %c0_i32 = arith.constant 0 : i32
    %c0_i32_0 = arith.constant 0 : i32
    return %arg0, %arg1, %c0_i32 : i32, i32, i32
  }
  func.func @transform_6(%arg0: i32, %arg1: i32) -> (i32, i32, i32) {
    %c0_i32 = arith.constant 0 : i32
    %c0_i32_0 = arith.constant 0 : i32
    return %arg0, %arg1, %c0_i32 : i32, i32, i32
  }
  func.func @transform_7(%arg0: i32, %arg1: i32) -> (i32, i32, i32) {
    %c0_i32 = arith.constant 0 : i32
    %c0_i32_0 = arith.constant 0 : i32
    return %arg0, %arg1, %c0_i32 : i32, i32, i32
  }
}

</mosaic_0001>

<bundles_post_ra>
// kernel: tpu_custom_call.1
= control target key start
LH: loop header
LB: loop body
LE: loop exit
PB: predicated region body
PF: predicated region fallthrough
CT: control target
= control target key end

     0   :  { %13 = vsyncpa [#allocation3], 0  ;;  %s1581_s0 = inlined_call_operand.hbm [shape: bf16[2,8,32], index: 0, kind: input, shape index: {}]   ;;  %s1582_s1 = inlined_call_operand.hbm [shape: f32[8,32], index: 1, kind: input, shape index: {}]   ;;  %s1583_s2 = inlined_call_operand.hbm [shape: f32[8,32], index: 2, kind: input, shape index: {}]   ;;  %s1584_s3 = inlined_call_operand.vmem [shape: f32[1,32], index: 3, kind: input, shape index: {}]   ;;  %s1585_s4 = inlined_call_operand.hbm [shape: bf16[32,160], index: 4, kind: input, shape index: {}]   ;;  %s1586_s5 = inlined_call_operand.hbm [shape: bf16[2,8,32], index: 5, kind: output, shape index: {0}]   ;;  %s1587_s6 = inlined_call_operand.hbm [shape: bf16[2,8,32], index: 6, kind: output, shape index: {1}]   ;;  %s1588_s7 = inlined_call_operand.hbm [shape: bf16[2,8,32], index: 7, kind: output, shape index: {2}]  }
   0x1   :  { %15 = vsyncpa [#allocation3 + $0x1], 0 }
   0x2   :  { %16 = vsyncpa [#allocation6], 0 }
   0x3   :  { %17 = vsyncpa [#allocation9], 0 }
   0x4   :  { %18 = vsyncpa [#allocation4], 0 }
   0x5   :  { %20 = vsyncpa [#allocation4 + $0x1], 0 }
   0x6   :  { %21 = vsyncpa [#allocation12], 0 }
   0x7   :  { %23 = vsyncpa [#allocation12 + $0x1], 0  ;;  %s1220_s24 = smov 0   ;;  %s1222_s25 = smov 0  }
   0x8   :  { %s1224_s26 = smov 0   ;;  %s1226_s27 = smov 0  }
   0x9   :  { %s1228_s28 = smov 0   ;;  %s1230_s29 = smov 0  }
   0xa LB: > { %s1251_s30 = sadd.s32 4294967295, %s1165_s29   ;;  %s1592_s8 = sadd.s32 4294967294, %s1165_s29   ;;  %s1165_s29 = sphi %s1230_s29, %s29_s29   ;;  %s1161_s28 = sphi %s1228_s28, %s1617_s28   ;;  %s1157_s27 = sphi %s1226_s27, %s1616_s27   ;;  %s1153_s26 = sphi %s1224_s26, %s1615_s26   ;;  %s1149_s25 = sphi %s1222_s25, %s1614_s25   ;;  %s1145_s24 = sphi %s1220_s24, %s1613_s24  }
   0xb   : > { %p63_p0 = scmp.ne.s32.totalorder %s1149_s25, %s1145_s24  ;;  %p1589_p1 = scmp.eq.s32.totalorder %s1251_s30, 0 }
   0xc   : > { %p189_p3 = scmp.eq.s32.totalorder %s1592_s8, 1  ;;  %p751_p5 = scmp.ge.s32.totalorder %s1165_s29, 1 }
   0xd   : > { %p1262_p4 = por %p1589_p1, %p63_p0  ;;  %p252_p7 = scmp.lt.s32.totalorder %s1165_s29, 3 }
   0xe   : > { %p1267_p6 = por %p189_p3, %p63_p0  ;;  %s1167_s12 = smov [#allocation5]  }
   0xf   : > { %s1594_s9 = scalar_select %p1262_p4, 1, 0 }
  0x10   : > { %s1595_s10 = scalar_select %p1267_p6, 1, 0 }
  0x11   : > { %p1272_p8 = pnand %p751_p5, %p252_p7  ;;  %s267_s13 = sshll.u32 %s1167_s12, 4  ;;  %s268_s13 = int_to_ptr.vmem [resolvable:$true] %s267_s13 }
  0x12   : > { %1596 = sst [smem:[#allocation19_spill]] %s1595_s10  ;;  %s1168_s14 = smov [#allocation7]  }
  0x13   : > { %s1597_s11 = scalar_select %p1272_p8, 1, 0 }
  0x14   : > { %p804_p10 = pneg %p1272_p8  ;;  %s280_s15 = sshll.u32 %s1168_s14, 4  ;;  %s1285_s15 = int_to_ptr.vmem [resolvable:$true] %s280_s15 }
  0x15   : > { %s1169_s17 = smov [#allocation8]   ;;  %s901_s21 = scalar_lea.hbm %s1582_s1, 128 }
  0x16   : > { %p1281_p11 = pnand %p804_p10, %p1589_p1  ;;  %s293_s18 = sshll.u32 %s1169_s17, 4  ;;  %s1287_s18 = int_to_ptr.vmem [resolvable:$true] %s293_s18 }
  0x17   : > { %p902_p12 = scmp.ne.s32.totalorder %s1582_s1, %s901_s21  ;;  %p908_p5 = scmp.lt.u32.totalorder %s901_s21, %s1582_s1 }
  0x18   : > { %p1297_p13 = pneg %p1281_p11 }
  0x1a   : > { %p904_p0 = pnand %p1297_p13, %p902_p12 }
  0x1c   : > { %p905_p3 = pneg %p904_p0 }
  0x1e   : > { %p910_p7 = pnand %p908_p5, %p905_p3 }
  0x20   : > { %913 = shalt.err (!%p910_p7)
}
  0x21   : > { %s914_s19 = scalar_lea.vmem %s268_s13, 128  ;;  %p922_p2 = scmp.lt.s32.totalorder %s268_s13, %s268_s13 }
  0x22   : > { %p915_p10 = scmp.ne.s32.totalorder %s268_s13, %s914_s19  ;;  %p923_p6 = scmp.lt.s32.totalorder %s914_s19, %s914_s19 }
  0x24   : > { %p917_p9 = pnand %p915_p10, %p1297_p13  ;;  %p924_p4 = por %p923_p6, %p922_p2 }
  0x26   : > { %p918_p1 = pneg %p917_p9 }
  0x28   : > { %p925_p8 = pnand %p924_p4, %p918_p1 }
  0x2a   : > { %928 = shalt.err (!%p925_p8)
}
  0x2b   : > { %807 = dma.hbm_to_vmem [thread:$0]  (!%p1281_p11), %s1582_s1, 128, %s268_s13, [#allocation6]  }
  0x2c   : > { %s929_s14 = scalar_lea.hbm %s1583_s2, 128 }
  0x2d   : > { %p930_p9 = scmp.ne.s32.totalorder %s1583_s2, %s929_s14  ;;  %p936_p1 = scmp.lt.u32.totalorder %s929_s14, %s1583_s2 }
  0x2f   : > { %p932_p12 = pnand %p930_p9, %p1297_p13 }
  0x31   : > { %p933_p2 = pneg %p932_p12 }
  0x33   : > { %p938_p4 = pnand %p936_p1, %p933_p2 }
  0x35   : > { %941 = shalt.err (!%p938_p4)
}
  0x36   : > { %s942_s13 = scalar_lea.vmem %s1285_s15, 128  ;;  %p950_p3 = scmp.lt.s32.totalorder %s1285_s15, %s1285_s15 }
  0x37   : > { %p943_p6 = scmp.ne.s32.totalorder %s1285_s15, %s942_s13  ;;  %p951_p5 = scmp.lt.s32.totalorder %s942_s13, %s942_s13 }
  0x39   : > { %p945_p8 = pnand %p943_p6, %p1297_p13  ;;  %p952_p7 = por %p951_p5, %p950_p3 }
  0x3b   : > { %p946_p0 = pneg %p945_p8 }
  0x3d   : > { %p953_p10 = pnand %p952_p7, %p946_p0 }
  0x3f   : > { %956 = shalt.err (!%p953_p10)
}
  0x40   : > { %810 = dma.hbm_to_vmem [thread:$0]  (!%p1281_p11), %s1583_s2, 128, %s1285_s15, [#allocation6]  }
  0x41   : > { %s957_s21 = scalar_lea.hbm %s1585_s4, 512 }
  0x42   : > { %p958_p9 = scmp.ne.s32.totalorder %s1585_s4, %s957_s21  ;;  %p964_p1 = scmp.lt.u32.totalorder %s957_s21, %s1585_s4 }
  0x44   : > { %p960_p12 = pnand %p958_p9, %p1297_p13 }
  0x46   : > { %p961_p2 = pneg %p960_p12 }
  0x48   : > { %p966_p4 = pnand %p964_p1, %p961_p2 }
  0x4a   : > { %969 = shalt.err (!%p966_p4)
}
  0x4b   : > { %s970_s15 = scalar_lea.vmem %s1287_s18, 512  ;;  %p978_p3 = scmp.lt.s32.totalorder %s1287_s18, %s1287_s18 }
  0x4c   : > { %p971_p6 = scmp.ne.s32.totalorder %s1287_s18, %s970_s15  ;;  %p979_p5 = scmp.lt.s32.totalorder %s970_s15, %s970_s15 }
  0x4e   : > { %p973_p8 = pnand %p971_p6, %p1297_p13  ;;  %p980_p7 = por %p979_p5, %p978_p3 }
  0x50   : > { %p974_p0 = pneg %p973_p8 }
  0x52   : > { %p981_p10 = pnand %p980_p7, %p974_p0 }
  0x54   : > { %984 = shalt.err (!%p981_p10)
}
  0x55   : > { %s1170_s13 = smov 128   ;;  %s1171_s12 = smov 8  }
  0x56   : > { %813 = dma.hbm_to_vmem [thread:$0]  (!%p1281_p11), %s1585_s4, 512, %s1287_s18, [#allocation9], %s1170_s13, %s1170_s13, %s1171_s12  }
  0x57   : > { %s50_s20 = sadd.s32 1, %s1153_s26  ;;  %s41_s22 = sadd.s32 1, %s1161_s28 }
  0x58   : > { %p57_p13 = scmp.ne.s32.totalorder %s1153_s26, %s1149_s25  ;;  %p43_p9 = scmp.ge.s32.totalorder %s41_s22, 2 }
  0x59   : > { %p58_p12 = scmp.eq.s32.totalorder %s1165_s29, 0  ;;  %p1600_p2 = scmp.eq.s32.totalorder %s1251_s30, 1 }
  0x5a   : > { %p831_p4 = scmp.lt.s32.totalorder %s1165_s29, 2  ;;  %s1619_s22 = smov (%p43_p9, %s41_s22), 0 }
  0x5b   : > { %p1366_p1 = por %p1600_p2, %p57_p13  ;;  %p59_p6 = por %p58_p12, %p57_p13 }
  0x5c   : > { %s307_s16 = sand.u32 1, %s1153_s26   ;;  %s45_s23 = ssub.s32 %s1161_s28, %s1619_s22 }
  0x5d   : > { %p48_p8 = scmp.eq.s32.totalorder %s45_s23, 0  ;;  %s756_s18 = sshll.u32 %s307_s16, 2 }
  0x5e   : > { %s757_s14 = sshll.u32 %s1161_s28, 6  ;;  %s311_s12 = scalar_lea.vmem [#allocation2], %s756_s18 }
  0x5f   : > { %s1378_s17 = scalar_select %p48_p8, %s1153_s26, %s50_s20  }
  0x60   : > { %s1383_s13 = scalar_lea.hbm %s1581_s0, %s757_s14  ;;  %s319_s8 = sshll.u32 %s311_s12, 4  ;;  %s1385_s8 = int_to_ptr.vmem [resolvable:$true] %s319_s8 }
  0x61   : > { %p1389_p11 = pnand %p831_p4, %p59_p6  ;;  %s308_s20 = scalar_lea.sflag [#allocation3], %s307_s16 }
  0x62   : > { %s985_s23 = scalar_lea.hbm %s1383_s13, 64  ;;  %s990_s19 = scalar_lea.hbm %s1581_s0, 128 }
  0x63   : > { %p986_p0 = scmp.ne.s32.totalorder %s1383_s13, %s985_s23  ;;  %p987_p3 = pneg %p1389_p11 }
  0x64   : > { %p991_p10 = scmp.lt.u32.totalorder %s1383_s13, %s1581_s0  ;;  %p992_p13 = scmp.lt.u32.totalorder %s990_s19, %s985_s23 }
  0x65   : > { %p988_p5 = pnand %p987_p3, %p986_p0  ;;  %p994_p12 = scmp.lt.u32.totalorder %s985_s23, %s1383_s13 }
  0x66   : > { %p993_p9 = por %p992_p13, %p991_p10 }
  0x67   : > { %p989_p7 = pneg %p988_p5 }
  0x68   : > { %p995_p2 = por %p994_p12, %p993_p9 }
  0x6a   : > { %p996_p4 = pnand %p995_p2, %p989_p7 }
  0x6c   : > { %999 = shalt.err (!%p996_p4)
}
  0x6d   : > { %s1000_s16 = scalar_lea.vmem %s1385_s8, 64  ;;  %s1172_s18 = smov [#allocation2]  }
  0x6e   : > { %p1001_p6 = scmp.ne.s32.totalorder %s1385_s8, %s1000_s16  ;;  %s1005_s14 = sshll.u32 %s1172_s18, 4  ;;  %s1006_s14 = int_to_ptr.vmem [resolvable:$false] %s1005_s14 }
  0x6f   : > { %s1007_s15 = scalar_lea.vmem %s1006_s14, 128  ;;  %p1008_p5 = scmp.lt.s32.totalorder %s1385_s8, %s1006_s14 }
  0x70   : > { %p1003_p8 = pnand %p1001_p6, %p987_p3  ;;  %p1009_p10 = scmp.lt.s32.totalorder %s1007_s15, %s1000_s16 }
  0x72   : > { %p1004_p0 = pneg %p1003_p8  ;;  %p1010_p13 = por %p1009_p10, %p1008_p5 }
  0x74   : > { %p1011_p9 = pnand %p1010_p13, %p1004_p0 }
  0x76   : > { %1014 = shalt.err (!%p1011_p9)
}
  0x77   : > { %817 = dma.hbm_to_vmem [thread:$0]  (!%p1389_p11), %s1383_s13, 64, %s1385_s8, %s308_s20  }
  0x78   : > { %p1603_p7 = scmp.ne.s32.totalorder %s1597_s11, 0 }
  0x79   : > { %s1421_s23 = sand.u32 (!%p1603_p7), 1, %s1149_s25   ;;  %p1604_p3 = scmp.ne.s32.totalorder (!%p1603_p7), %s1594_s9, 0 }
  0x7a   : > { %328 = sbr.rel (%p1603_p7) target bundleno = 791 (0x317), region = 40  ;;  %s1424_s19 = sshll.u32 (!%p1603_p7), %s1421_s23, 2 }
  0x7b   : > { %s331_s12 = scalar_lea.sflag (!%p1603_p7), [#allocation3], %s1421_s23  ;;  %s334_s16 = scalar_lea.vmem (!%p1603_p7), [#allocation2], %s1424_s19 }
  0x81   : > { %1124 = dma.done.wait (%p1604_p3), %s331_s12, 64  }
  0x82   : > { %1126 = vsyncadd (%p1604_p3), %s331_s12, 4294967232  ;;  %p1605_p11 = scmp.eq.s32.totalorder %s1251_s30, 0 }
  0x84   : > { %1128 = dma.done.wait (%p1605_p11), [#allocation6], 256   ;;  %p1606_p12 = pmov %p1605_p11 }
  0x85   : > { %p1607_p2 = pmov %p1605_p11 }
  0x86   : > { %1130 = vsyncadd (%p1606_p12), [#allocation6], 4294967040 }
  0x87   : > { %1132 = dma.done.wait (%p1607_p2), [#allocation9], 512   ;;  %p1608_p4 = pmov %p1607_p2 }
  0x88   : > { %v388_v0 = vld [vmem:[%s334_s16] sm:$0xf]  ;;  %vm392_vm0 = vcmask 261120   ;;  %v896_v6 = vld [vmem:[#allocation8 + $0x14] ss:$8 sps:$4 sm:$0xff]   ;;  %v1173_v7 = vmov 0  }
  0x89   : > { %1134 = vsyncadd (%p1608_p4), [#allocation9], 4294966784  ;;  %v389_v1 = vunpack.c.l.bf16 %v388_v0  ;;  %v893_v4 = vld [vmem:[#allocation8 + $0x4] ss:$8 sps:$4 sm:$0xff]   ;;  %v895_v5 = vld [vmem:[#allocation8] ss:$8 sps:$4 sm:$0xff]   ;;  %468 = vmatprep.mubr.bf16.mxu0 %v1173_v7 }
  0x8a   : > { %436 = vmatprep.subr.bf16.mxu0 %v893_v4  ;;  %v898_v8 = vld [vmem:[#allocation8 + $0x10] ss:$8 sps:$4 sm:$0xff]   ;;  %s1174_s9 = smov 96   ;;  %s1175_s11 = smov 32   ;;  %v766_v15 = vld [vmem:[%s1584_s3] ss:$0 sm:$0xff] }
  0x8b   : > { %v391_v2 = vmul.f32 %v389_v1, %v389_v1  ;;  %437 = vmatpush1.bf16.msra.mxu0 %v895_v5  ;;  %v478_v9 = vld [vmem:[#allocation7] sm:$0xff]  ;;  %v477_v10 = vld [vmem:[#allocation5] sm:$0xff]  ;;  %s1447_s10 = sshll.u32 %s1157_s27, 6  ;;  %s372_s20 = scalar_lea.vmem [#allocation10], %s1424_s19  ;;  %vm491_vm1 = vcmask 257024  }
  0x8c   : > { %438 = vmatprep.subr.bf16.mxu0 %v896_v6  ;;  %481 = vrot.lane.b32.xlu1 %v478_v9, %s1174_s9  ;;  %s545_s18 = sshll.u32 %s372_s20, 4  ;;  %s1455_s12 = scalar_lea.hbm %s1586_s5, %s1447_s10  ;;  %s1457_s18 = int_to_ptr.vmem [resolvable:$true] %s545_s18 }
  0x8d   : > { %v393_v3 = vsel %vm392_vm0, %v391_v2, 0.0  ;;  %s1176_s27 = smov 64   ;;  %s521_s16 = scalar_lea.sflag [#allocation4], %s1421_s23 }
  0x8e   : > { %394 = vadd.xlane.f32.xlu0 %v393_v3 }
  0x8f   : > { %439 = vmatpush1.bf16.msra.mxu0 %v898_v8 }
  0xa4   : > { %494 = vrot.lane.b32.xlu0 %v477_v10, %s1175_s11 }
  0xfe   : > { %v482_v23 = vpop.permute.xlu1 %481 }
 0x11b   : > { %v395_v11 = vpop.xlane.xlu0 %394 }
 0x11c   : > { %v397_v12 = vmul.f32 0.03125, %v395_v11 }
 0x11e   : > { %v398_v13 = vadd.f32 1e-05, %v397_v12 }
 0x11f   : > { %v495_v26 = vpop.permute.xlu0 %494 }
 0x120   : > { %899 = vrsqrt.f32 %v398_v13 }
 0x12a   : > { %v900_v14 = vpop.eup %899 }
 0x12b   : > { %v400_v16 = vmul.f32 %v900_v14, %v389_v1 }
 0x12d   : > { %v407_v17 = vmul.f32 %v766_v15, %v400_v16 }
 0x12f   : > { %v408_v18 = vpack.c.bf16 %v407_v17, %v407_v17 }
 0x131   : > { %771 = vmatmul.mubr.msk.bf16.vlgmr.msra.gmra.mrb[0].mxu0 %vm392_vm0, %v408_v18 }
 0x204   : > { %v470_v19 = vpop.f32.mrb[0].mxu0 }
 0x205   : > { %v472_v20 = vpop.f32.mrb[1].mxu0  ;;  %v484_v25 = vmul.f32 %v482_v23, %v470_v19  ;;  %v497_v27 = vmul.f32 %v495_v26, %v470_v19  ;;  %v479_v31 = vmul.f32 %v477_v10, %v470_v19  ;;  %v783_v35 = vpack.c.bf16 %v470_v19, %v470_v19 }
 0x206   : > { %v498_v21 = vmul.f32 %v478_v9, %v472_v20  ;;  %v474_v22 = vpop.f32.mrb[2].mxu0 }
 0x207   : > { %v475_v24 = vpop.f32.mrb[3].mxu0 }
 0x208   : > { %500 = vrot.lane.b32.xlu1 %v498_v21, %s1175_s11 }
 0x20c   : > { %486 = vrot.lane.b32.xlu1 %v484_v25, %s1175_s11  ;;  %s1015_s11 = scalar_lea.vmem %s1457_s18, 64 }
 0x20d   : > { %p1016_p6 = scmp.ne.s32.totalorder %s1457_s18, %s1015_s11 }
 0x20f   : > { %p1017_p8 = pnand %p1016_p6, %p1366_p1 }
 0x211   : > { %p1018_p0 = pneg %p1017_p8 }
 0x27a   : > { %v501_v28 = vpop.permute.xlu1 %500 }
 0x27b   : > { %v503_v29 = vadd.f32 %v501_v28, %v497_v27 }
 0x27d   : > { %v782_v30 = vpack.c.bf16 %v503_v29, %v503_v29 }
 0x27e   : > { %v487_v32 = vpop.permute.xlu1 %486 }
 0x27f   : > { %v489_v33 = vadd.f32 %v487_v32, %v479_v31  ;;  %508 = vrot.lane.b32.xlu1 %v782_v30, %s1174_s9  ;;  %s1177_s9 = smov [#allocation10]  }
 0x280   : > { %s1019_s13 = sshll.u32 %s1177_s9, 4  ;;  %s1020_s13 = int_to_ptr.vmem [resolvable:$false] %s1019_s13 }
 0x281   : > { %v490_v34 = vpack.c.bf16 %v489_v33, %v489_v33  ;;  %s1021_s8 = scalar_lea.vmem %s1020_s13, 128  ;;  %p1022_p5 = scmp.lt.s32.totalorder %s1457_s18, %s1020_s13 }
 0x282   : > { %p1023_p10 = scmp.lt.s32.totalorder %s1021_s8, %s1015_s11 }
 0x283   : > { %516 = vrot.lane.b32.xlu1 %v783_v35, %s1176_s27  ;;  %492 = vst.msk [vmem:[%s372_s20] sm:$0xf] %vm491_vm1, %v490_v34 }
 0x284   : > { %p1024_p13 = por %p1023_p10, %p1022_p5 }
 0x286   : > { %p1025_p9 = pnand %p1024_p13, %p1018_p0 }
 0x288   : > { %1028 = shalt.err (!%p1025_p9)
}
 0x289   : > { %s1029_s23 = scalar_lea.hbm %s1455_s12, 64  ;;  %s1033_s15 = scalar_lea.hbm %s1586_s5, 128 }
 0x28a   : > { %p1030_p7 = scmp.ne.s32.totalorder %s1455_s12, %s1029_s23  ;;  %p1034_p12 = scmp.lt.u32.totalorder %s1455_s12, %s1586_s5 }
 0x28b   : > { %p1035_p2 = scmp.lt.u32.totalorder %s1033_s15, %s1029_s23  ;;  %p1037_p6 = scmp.lt.u32.totalorder %s1029_s23, %s1455_s12 }
 0x28c   : > { %p1031_p3 = pnand %p1030_p7, %p1366_p1 }
 0x28d   : > { %p1036_p4 = por %p1035_p2, %p1034_p12 }
 0x28e   : > { %p1032_p11 = pneg %p1031_p3 }
 0x28f   : > { %p1038_p8 = por %p1037_p6, %p1036_p4 }
 0x291   : > { %p1039_p0 = pnand %p1038_p8, %p1032_p11 }
 0x293   : > { %1042 = shalt.err (!%p1039_p0)
}
 0x294   : > { %798 = dma.vmem_to_hbm [thread:$0]  (%p1366_p1), %s1457_s18, 64, %s1455_s12, %s521_s16  }
 0x295   : > { %s525_s11 = sand.u32 1, %s1251_s30   ;;  %s379_s13 = scalar_lea.vmem [#allocation11], %s1424_s19 }
 0x296   : > { %s559_s8 = sshll.u32 %s379_s13, 4  ;;  %s1488_s23 = scalar_lea.hbm %s1587_s6, %s1447_s10  ;;  %s1490_s8 = int_to_ptr.vmem [resolvable:$true] %s559_s8 }
 0x297   : > { %s386_s15 = scalar_lea.vmem [#allocation13], %s1424_s19  ;;  %s1498_s30 = scalar_lea.sflag [#allocation12], %s525_s11 }
 0x298   : > { %s1495_s27 = sshll.u32 %s386_s15, 4  ;;  %s1043_s18 = scalar_lea.vmem %s1490_s8, 64  ;;  %s1529_s27 = int_to_ptr.vmem [resolvable:$true] %s1495_s27 }
 0x299   : > { %p1044_p5 = scmp.ne.s32.totalorder %s1490_s8, %s1043_s18  ;;  %s1178_s12 = smov [#allocation11]  }
 0x29a   : > { %s1047_s16 = sshll.u32 %s1178_s12, 4  ;;  %s1048_s16 = int_to_ptr.vmem [resolvable:$false] %s1047_s16 }
 0x29b   : > { %p1045_p10 = pnand %p1044_p5, %p1366_p1  ;;  %s1049_s9 = scalar_lea.vmem %s1048_s16, 128 }
 0x29c   : > { %p1050_p9 = scmp.lt.s32.totalorder %s1490_s8, %s1048_s16  ;;  %p1051_p7 = scmp.lt.s32.totalorder %s1049_s9, %s1043_s18 }
 0x29d   : > { %p1046_p13 = pneg %p1045_p10 }
 0x29e   : > { %p1052_p3 = por %p1051_p7, %p1050_p9 }
 0x2a0   : > { %p1053_p11 = pnand %p1052_p3, %p1046_p13 }
 0x2f1   : > { %v509_v36 = vpop.permute.xlu1 %508 }
 0x2f2   : > { %511 = vst.msk [vmem:[%s379_s13] sm:$0xf] %vm491_vm1, %v509_v36 }
 0x2f3   : > { %1056 = shalt.err (!%p1053_p11)
}
 0x2f4   : > { %s1057_s11 = scalar_lea.hbm %s1488_s23, 64  ;;  %s1061_s14 = scalar_lea.hbm %s1587_s6, 128 }
 0x2f5   : > { %p1058_p12 = scmp.ne.s32.totalorder %s1488_s23, %s1057_s11  ;;  %p1062_p6 = scmp.lt.u32.totalorder %s1488_s23, %s1587_s6 }
 0x2f6   : > { %p1063_p8 = scmp.lt.u32.totalorder %s1061_s14, %s1057_s11  ;;  %p1065_p5 = scmp.lt.u32.totalorder %s1057_s11, %s1488_s23 }
 0x2f7   : > { %p1059_p2 = pnand %p1058_p12, %p1366_p1 }
 0x2f8   : > { %p1064_p0 = por %p1063_p8, %p1062_p6 }
 0x2f9   : > { %p1060_p4 = pneg %p1059_p2 }
 0x2fa   : > { %p1066_p10 = por %p1065_p5, %p1064_p0 }
 0x2fc   : > { %p1067_p13 = pnand %p1066_p10, %p1060_p4 }
 0x2fe   : > { %1070 = shalt.err (!%p1067_p13)
}
 0x2ff   : > { %799 = dma.vmem_to_hbm [thread:$0]  (%p1366_p1), %s1490_s8, 64, %s1488_s23, %s1498_s30   ;;  %v517_v37 = vpop.permute.xlu1 %516 }
 0x300   : > { %s1526_s13 = scalar_lea.hbm %s1588_s7, %s1447_s10  ;;  %519 = vst.msk [vmem:[%s386_s15] sm:$0xf] %vm491_vm1, %v517_v37  ;;  %s1071_s11 = scalar_lea.vmem %s1529_s27, 64 }
 0x301   : > { %p1072_p9 = scmp.ne.s32.totalorder %s1529_s27, %s1071_s11  ;;  %s1179_s8 = smov [#allocation13]  }
 0x302   : > { %s1075_s23 = sshll.u32 %s1179_s8, 4  ;;  %s1076_s23 = int_to_ptr.vmem [resolvable:$false] %s1075_s23 }
 0x303   : > { %p1073_p7 = pnand %p1072_p9, %p1366_p1  ;;  %s1077_s20 = scalar_lea.vmem %s1076_s23, 128 }
 0x304   : > { %p1078_p11 = scmp.lt.s32.totalorder %s1529_s27, %s1076_s23  ;;  %p1079_p12 = scmp.lt.s32.totalorder %s1077_s20, %s1071_s11 }
 0x305   : > { %p1074_p3 = pneg %p1073_p7 }
 0x306   : > { %p1080_p2 = por %p1079_p12, %p1078_p11 }
 0x308   : > { %p1081_p4 = pnand %p1080_p2, %p1074_p3 }
 0x30a   : > { %1084 = shalt.err (!%p1081_p4)
}
 0x30b   : > { %s1085_s19 = scalar_lea.hbm %s1526_s13, 64  ;;  %s1089_s14 = scalar_lea.hbm %s1588_s7, 128 }
 0x30c   : > { %p1086_p6 = scmp.ne.s32.totalorder %s1526_s13, %s1085_s19  ;;  %p1090_p5 = scmp.lt.u32.totalorder %s1526_s13, %s1588_s7 }
 0x30d   : > { %p1091_p10 = scmp.lt.u32.totalorder %s1089_s14, %s1085_s19  ;;  %p1093_p9 = scmp.lt.u32.totalorder %s1085_s19, %s1526_s13 }
 0x30e   : > { %p1087_p8 = pnand %p1086_p6, %p1366_p1 }
 0x30f   : > { %p1092_p13 = por %p1091_p10, %p1090_p5 }
 0x310   : > { %p1088_p0 = pneg %p1087_p8 }
 0x311   : > { %p1094_p7 = por %p1093_p9, %p1092_p13 }
 0x313   : > { %p1095_p3 = pnand %p1094_p7, %p1088_p0 }
 0x315   : > { %1098 = shalt.err (!%p1095_p3)
}
 0x316   : > { %800 = dma.vmem_to_hbm [thread:$0]  (%p1366_p1), %s1529_s27, 64, %s1526_s13, %s1498_s30  }
 0x317 PF: > { %s1609_s18 = sld [smem:[#allocation19_spill]]  ;;  %s585_s9 = sand.u32 1, %s1145_s24  }
 0x318   : > { %p1611_p12 = scmp.ge.s32.totalorder %s1165_s29, 2  ;;  %s586_s11 = scalar_lea.sflag [#allocation4], %s585_s9 }
 0x31d   : > { %p1610_p11 = scmp.ne.s32.totalorder %s1609_s18, 0 }
 0x31f   : > { %p819_p2 = pnand %p1611_p12, %p1610_p11 }
 0x321   : > { %1136 = dma.done.wait (!%p819_p2), %s586_s11, 64  }
 0x322   : > { %1138 = vsyncadd (!%p819_p2), %s586_s11, 4294967232  ;;  %s1612_s8 = sadd.s32 4294967294, %s1165_s29  }
 0x323   : > { %s594_s23 = sand.u32 1, %s1612_s8  }
 0x324   : > { %s595_s20 = scalar_lea.sflag [#allocation12], %s594_s23 }
 0x325   : > { %1140 = dma.done.wait (!%p819_p2), %s595_s20, 128  }
 0x326   : > { %1142 = vsyncadd (!%p819_p2), %s595_s20, 4294967168  ;;  %s29_s29 = sadd.s32 1, %s1165_s29   ;;  %s1613_s24 = smov %s1149_s25 }
 0x327   : > { %p26_p1 = scmp.ge.s32.totalorder %s29_s29, 4   ;;  %s1614_s25 = smov %s1153_s26 }
 0x328   : > { %s1615_s26 = smov %s1378_s17  ;;  %s1616_s27 = smov %s1161_s28 }
 0x329   : > { %s1617_s28 = smov %s1619_s22  ;;  %28 = sbr.rel (!%p26_p1) target bundleno = 10 (0xa), region = 131 }
 0x330   :  { %609 = vsyncpa [#allocation3], 1 }
 0x331   :  { %611 = vsyncpa [#allocation3 + $0x1], 1 }
 0x332   :  { %612 = vsyncpa [#allocation6], 1 }
 0x333   :  { %613 = vsyncpa [#allocation9], 1 }
 0x334   :  { %614 = vsyncpa [#allocation4], 1 }
 0x335   :  { %616 = vsyncpa [#allocation4 + $0x1], 1 }
 0x336   :  { %617 = vsyncpa [#allocation12], 1 }
 0x337   :  { %619 = vsyncpa [#allocation12 + $0x1], 1 }

</bundles_post_ra>
